<compile_context>
chip_gen: v5e
topology: v5e:2x2
jax: 0.10.0
libtpu: 0.0.40
codegen_flags: <defaults>
</compile_context>

<pallas_src>
import functools

import jax
import jax.numpy as jnp
from jax.experimental import pallas as pl
from jax.experimental.pallas import tpu as pltpu


def _round_up(x: int, m: int) -> int:
    return ((x + m - 1) // m) * m


def _pick_tile(dim: int, tile_max: int, align: int) -> int:
    """Largest tile <= tile_max, multiple of `align`, minimising pad waste."""
    target = _round_up(max(dim, align), align)
    if target <= tile_max:
        return target
    n_tiles = -(-target // tile_max)
    return _round_up(-(-target // n_tiles), align)


# ---------------------------------------------------------------------------
# Kernel: out[i,j] = sum_k x[i,k] @ Wt[k,j]  + bias[j]  + xa[i] @ B[j]
# ---------------------------------------------------------------------------
def lora_kernel(x_ref, wt_ref, bias_ref, xa_ref, b_ref, o_ref, acc_ref):
    k = pl.program_id(2)

    # ---- init (first K step): fold bias into the accumulator ------------
    @pl.when(k == 0)
    def _():
        acc_ref[...] = jnp.broadcast_to(
            bias_ref[...].astype(jnp.float32), acc_ref.shape)

    # ---- main GEMM accumulation: x @ W.T (bf16 inputs, f32 accum) -------
    acc_ref[...] += jnp.dot(x_ref[...], wt_ref[...],
                            preferred_element_type=jnp.float32)

    # ---- epilogue (last K step): add LoRA (xa @ B), single writeback ----
    @pl.when(k == pl.num_programs(2) - 1)
    def _():
        lora = jnp.dot(xa_ref[...], b_ref[...],
                       preferred_element_type=jnp.float32)   # (tm, tn) f32
        o_ref[...] = (acc_ref[...] + lora).astype(o_ref.dtype)


# ---------------------------------------------------------------------------
# One-time weight preparation (outside the per-call jitted forward):
# pre-transpose W to (d_in, d_out), zero-pad to tile multiples, cast to bf16.
# ---------------------------------------------------------------------------
def prepare_lora_params(w, bias, lora_a, lora_b, *,
                        tn_max: int = 512, tk_max: int = 1024):
    d_out, d_in = w.shape
    rank = lora_a.shape[1]

    tn = _pick_tile(d_out, tn_max, 128)
    tk = _pick_tile(d_in, tk_max, 128)
    r_pad = _round_up(max(rank, 128), 128)
    Kp = _round_up(d_in, tk)
    Np = _round_up(d_out, tn)

    wt_p = jnp.zeros((Kp, Np), jnp.bfloat16).at[:d_in, :d_out].set(
        w.T.astype(jnp.bfloat16))                         # lane-dense along d_out
    bias_p = jnp.zeros((1, Np), jnp.float32).at[0, :d_out].set(
        bias.astype(jnp.float32))
    a_p = jnp.zeros((Kp, r_pad), jnp.bfloat16).at[:d_in, :rank].set(
        lora_a.astype(jnp.bfloat16))
    b_p = jnp.zeros((r_pad, Np), jnp.bfloat16).at[:rank, :d_out].set(
        lora_b.astype(jnp.bfloat16))

    return dict(wt_p=wt_p, bias_p=bias_p, a_p=a_p, b_p=b_p,
                d_out=d_out, tn=tn, tk=tk)


@functools.partial(jax.jit, static_argnames=("d_out", "tm", "tn", "tk"))
def _lora_forward_impl(x, wt_p, bias_p, a_p, b_p, *, d_out, tm, tn, tk):
    M, d_in = x.shape
    Kp, Np = wt_p.shape
    r_pad = a_p.shape[1]
    Mp = _round_up(M, tm)

    # Pad x only if needed; stream it in bf16 (accumulation stays f32).
    x_bf = x.astype(jnp.bfloat16)
    if (M, d_in) != (Mp, Kp):
        xp = jnp.zeros((Mp, Kp), jnp.bfloat16).at[:M, :d_in].set(x_bf)
    else:
        xp = x_bf

    # xa = x @ A hoisted out of the kernel (tiny: (Mp, r_pad)); rank-padded.
    xa = jnp.dot(xp, a_p, preferred_element_type=jnp.float32).astype(jnp.bfloat16)

    grid = (Mp // tm, Np // tn, Kp // tk)

    # VMEM budget from the real (double-buffered) tile footprint, capped well
    # under v7x's 64 MiB per-TC physical VMEM.
    bf16b, f32b = 2, 4
    tile_bytes = (
        2 * (tm * tk + tk * tn + tm * r_pad + r_pad * tn) * bf16b   # bf16 inputs
        + 2 * tn * f32b                                             # bias tile
        + 2 * tm * tn * f32b                                        # out tile
        + tm * tn * f32b                                            # acc scratch
    )
    vmem_limit = int(min(tile_bytes + (16 << 20), 48 << 20))

    out_p = pl.pallas_call(
        lora_kernel,
        out_shape=jax.ShapeDtypeStruct((Mp, Np), x.dtype),
        grid_spec=pltpu.PrefetchScalarGridSpec(
            num_scalar_prefetch=0,
            grid=grid,
            in_specs=[
                pl.BlockSpec((tm, tk), lambda i, j, k: (i, k)),       # x (bf16)
                pl.BlockSpec((tk, tn), lambda i, j, k: (k, j)),       # W.T (bf16)
                pl.BlockSpec((1, tn), lambda i, j, k: (0, j)),        # bias (f32)
                pl.BlockSpec((tm, r_pad), lambda i, j, k: (i, 0)),    # xa (bf16)
                pl.BlockSpec((r_pad, tn), lambda i, j, k: (0, j)),    # B (bf16)
            ],
            out_specs=pl.BlockSpec((tm, tn), lambda i, j, k: (i, j)),
            scratch_shapes=[
                pltpu.VMEM((tm, tn), jnp.float32),    # f32 accumulator
            ],
        ),
        compiler_params=pltpu.CompilerParams(
            # M and N both megacore-parallel (xa carries nothing across N
            # anymore); K is the reduction axis.
            dimension_semantics=("parallel", "parallel", "arbitrary"),
            vmem_limit_bytes=vmem_limit,
        ),
    )(xp, wt_p, bias_p, xa, b_p)

    return out_p[:M, :d_out]


def lora_forward(x, params, *, tm_max: int = 512):
    M = x.shape[0]
    tm = _pick_tile(M, tm_max, 16)   # 16-row alignment keeps bf16 tiles happy
    return _lora_forward_impl(
        x, params["wt_p"], params["bias_p"], params["a_p"], params["b_p"],
        d_out=params["d_out"], tm=tm, tn=params["tn"], tk=params["tk"])


def _reference(x, w, bias, lora_a, lora_b):
    return x @ w.T + bias + (x @ lora_a) @ lora_b


def _check(out, ref, tol, name):
    err = float(jnp.max(jnp.abs(out - ref)))
    scale = float(jnp.maximum(jnp.max(jnp.abs(ref)), 1.0))
    assert out.shape == ref.shape, f"shape mismatch ({name})"
    assert err / scale < tol, f"mismatch ({name}): err={err} scale={scale}"


if __name__ == "__main__":
    key = jax.random.PRNGKey(0)

    # --- Case 1: small shapes consistent with the module ------------------
    # Linear(in_dim=32, out_dim=32) wrapped with rank-4 LoRA, batch=8.
    batch, in_dim, out_dim, rank = 8, 32, 32, 4
    kx, kw, kb, ka, kbb, key = jax.random.split(key, 6)
    x = jax.random.normal(kx, (batch, in_dim), dtype=jnp.float32)
    w = jax.random.normal(kw, (out_dim, in_dim), dtype=jnp.float32) * 0.1
    bias = jax.random.normal(kb, (out_dim,), dtype=jnp.float32) * 0.1
    lora_a = jax.random.normal(ka, (in_dim, rank), dtype=jnp.float32) * 0.01
    lora_b = jax.random.normal(kbb, (rank, out_dim), dtype=jnp.float32) * 0.01

    params = prepare_lora_params(w, bias, lora_a, lora_b)   # one-time prep
    out = lora_forward(x, params)
    jax.block_until_ready(out)
    ref = _reference(x, w, bias, lora_a, lora_b)
    _check(out, ref, 2e-2, "small case")   # bf16 inputs -> loosened tolerance

    # --- Case 2: multi-tile, non-aligned shapes (exercises the 3-D grid,
    #     K accumulation, hoisted xa and padding paths) --------------------
    M2, din2, dout2, r2 = 300, 1100, 700, 4
    kx, kw, kb, ka, kbb, key = jax.random.split(key, 6)
    x2 = jax.random.normal(kx, (M2, din2), dtype=jnp.float32)
    w2 = jax.random.normal(kw, (dout2, din2), dtype=jnp.float32) * 0.1
    bias2 = jax.random.normal(kb, (dout2,), dtype=jnp.float32) * 0.1
    a2 = jax.random.normal(ka, (din2, r2), dtype=jnp.float32) * 0.01
    b2 = jax.random.normal(kbb, (r2, dout2), dtype=jnp.float32) * 0.01

    params2 = prepare_lora_params(w2, bias2, a2, b2)
    out2 = lora_forward(x2, params2)
    jax.block_until_ready(out2)
    ref2 = _reference(x2, w2, bias2, a2, b2)
    _check(out2, ref2, 3e-2, "tiled case")

    print("KERNEL_OK")
</pallas_src>

<mosaic_0001>
module attributes {stable_mosaic.version = 11 : i64} {
  func.func @lora_kernel(%arg0: i32, %arg1: i32, %arg2: i32, %arg3: memref<16x128xbf16, #tpu.memory_space<vmem>>, %arg4: memref<128x128xbf16, #tpu.memory_space<vmem>>, %arg5: memref<1x128xf32, #tpu.memory_space<vmem>>, %arg6: memref<16x128xbf16, #tpu.memory_space<vmem>>, %arg7: memref<128x128xbf16, #tpu.memory_space<vmem>>, %arg8: memref<16x128xf32, #tpu.memory_space<vmem>>, %arg9: memref<16x128xf32, #tpu.memory_space<vmem>>) attributes {dimension_semantics = [#tpu.dimension_semantics<parallel>, #tpu.dimension_semantics<parallel>, #tpu.dimension_semantics<arbitrary>], iteration_bounds = array<i64: 1, 1, 1>, scalar_prefetch = 0 : i64, scratch_operands = 1 : i64, tpu.core_type = #tpu.core_type<tc>, window_params = [{transform_indices = @transform_0, window_bounds = array<i64: 16, 128>}, {transform_indices = @transform_1, window_bounds = array<i64: 128, 128>}, {transform_indices = @transform_2, window_bounds = array<i64: 1, 128>}, {transform_indices = @transform_3, window_bounds = array<i64: 16, 128>}, {transform_indices = @transform_4, window_bounds = array<i64: 128, 128>}, {transform_indices = @transform_5, window_bounds = array<i64: 16, 128>}]} {
    %c0_i32 = arith.constant 0 : i32
    %0 = arith.cmpi eq, %arg2, %c0_i32 : i32
    %1 = arith.extui %0 : i1 to i32
    %c0_i32_0 = arith.constant 0 : i32
    %2 = arith.cmpi ne, %1, %c0_i32_0 : i32
    scf.if %2 {
      %c0_10 = arith.constant 0 : index
      %c0_11 = arith.constant 0 : index
      %12 = vector.load %arg5[%c0_10, %c0_11] : memref<1x128xf32, #tpu.memory_space<vmem>>, vector<1x128xf32>
      %13 = vector.shape_cast %12 : vector<1x128xf32> to vector<1x128xf32>
      %14 = vector.broadcast %13 : vector<1x128xf32> to vector<16x128xf32>
      %c0_12 = arith.constant 0 : index
      %c0_13 = arith.constant 0 : index
      %15 = vector.load %arg9[%c0_12, %c0_13] : memref<16x128xf32, #tpu.memory_space<vmem>>, vector<16x128xf32>
      tpu.vector_store %arg9[%c0_12, %c0_13], %14 {strides = array<i32>} : memref<16x128xf32, #tpu.memory_space<vmem>>, vector<16x128xf32>,
    } else {
    }
    %c0 = arith.constant 0 : index
    %c0_1 = arith.constant 0 : index
    %3 = vector.load %arg9[%c0, %c0_1] : memref<16x128xf32, #tpu.memory_space<vmem>>, vector<16x128xf32>
    %c0_2 = arith.constant 0 : index
    %c0_3 = arith.constant 0 : index
    %4 = vector.load %arg3[%c0_2, %c0_3] : memref<16x128xbf16, #tpu.memory_space<vmem>>, vector<16x128xbf16>
    %c0_4 = arith.constant 0 : index
    %c0_5 = arith.constant 0 : index
    %5 = vector.load %arg4[%c0_4, %c0_5] : memref<128x128xbf16, #tpu.memory_space<vmem>>, vector<128x128xbf16>
    %cst = arith.constant dense<0.000000e+00> : vector<16x128xf32>
    %6 = tpu.matmul %4, %5, %cst {dimension_numbers = #tpu.dot_dimension_numbers<[1], [0], [0], [1], [0, 0, 1, 1], [], []>} : vector<16x128xbf16>, vector<128x128xbf16>, vector<16x128xf32> -> vector<16x128xf32>
    %7 = arith.addf %3, %6 : vector<16x128xf32>
    %c0_6 = arith.constant 0 : index
    %c0_7 = arith.constant 0 : index
    %8 = vector.load %arg9[%c0_6, %c0_7] : memref<16x128xf32, #tpu.memory_space<vmem>>, vector<16x128xf32>
    tpu.vector_store %arg9[%c0_6, %c0_7], %7 {strides = array<i32>} : memref<16x128xf32, #tpu.memory_space<vmem>>, vector<16x128xf32>,
    %c0_i32_8 = arith.constant 0 : i32
    %9 = arith.cmpi eq, %arg2, %c0_i32_8 : i32
    %10 = arith.extui %9 : i1 to i32
    %c0_i32_9 = arith.constant 0 : i32
    %11 = arith.cmpi ne, %10, %c0_i32_9 : i32
    scf.if %11 {
      %c0_10 = arith.constant 0 : index
      %c0_11 = arith.constant 0 : index
      %12 = vector.load %arg6[%c0_10, %c0_11] : memref<16x128xbf16, #tpu.memory_space<vmem>>, vector<16x128xbf16>
      %c0_12 = arith.constant 0 : index
      %c0_13 = arith.constant 0 : index
      %13 = vector.load %arg7[%c0_12, %c0_13] : memref<128x128xbf16, #tpu.memory_space<vmem>>, vector<128x128xbf16>
      %cst_14 = arith.constant dense<0.000000e+00> : vector<16x128xf32>
      %14 = tpu.matmul %12, %13, %cst_14 {dimension_numbers = #tpu.dot_dimension_numbers<[1], [0], [0], [1], [0, 0, 1, 1], [], []>} : vector<16x128xbf16>, vector<128x128xbf16>, vector<16x128xf32> -> vector<16x128xf32>
      %c0_15 = arith.constant 0 : index
      %c0_16 = arith.constant 0 : index
      %15 = vector.load %arg9[%c0_15, %c0_16] : memref<16x128xf32, #tpu.memory_space<vmem>>, vector<16x128xf32>
      %16 = arith.addf %15, %14 : vector<16x128xf32>
      %c0_17 = arith.constant 0 : index
      %c0_18 = arith.constant 0 : index
      %17 = vector.load %arg8[%c0_17, %c0_18] : memref<16x128xf32, #tpu.memory_space<vmem>>, vector<16x128xf32>
      tpu.vector_store %arg8[%c0_17, %c0_18], %16 {strides = array<i32>} : memref<16x128xf32, #tpu.memory_space<vmem>>, vector<16x128xf32>,
    } else {
    }
    return
  }
  func.func @transform_0(%arg0: i32, %arg1: i32, %arg2: i32) -> (i32, i32) {
    %c0_i32 = arith.constant 0 : i32
    return %arg0, %arg2 : i32, i32
  }
  func.func @transform_1(%arg0: i32, %arg1: i32, %arg2: i32) -> (i32, i32) {
    %c0_i32 = arith.constant 0 : i32
    return %arg2, %arg1 : i32, i32
  }
  func.func @transform_2(%arg0: i32, %arg1: i32, %arg2: i32) -> (i32, i32) {
    %c0_i32 = arith.constant 0 : i32
    %c0_i32_0 = arith.constant 0 : i32
    return %c0_i32, %arg1 : i32, i32
  }
  func.func @transform_3(%arg0: i32, %arg1: i32, %arg2: i32) -> (i32, i32) {
    %c0_i32 = arith.constant 0 : i32
    %c0_i32_0 = arith.constant 0 : i32
    return %arg0, %c0_i32 : i32, i32
  }
  func.func @transform_4(%arg0: i32, %arg1: i32, %arg2: i32) -> (i32, i32) {
    %c0_i32 = arith.constant 0 : i32
    %c0_i32_0 = arith.constant 0 : i32
    return %c0_i32, %arg1 : i32, i32
  }
  func.func @transform_5(%arg0: i32, %arg1: i32, %arg2: i32) -> (i32, i32) {
    %c0_i32 = arith.constant 0 : i32
    return %arg0, %arg1 : i32, i32
  }
}

</mosaic_0001>

<bundles_post_ra>
// kernel: _lora_forward_impl.1
= control target key start
LH: loop header
LB: loop body
LE: loop exit
PB: predicated region body
PF: predicated region fallthrough
CT: control target
= control target key end

     0   :  { %10 = vsyncpa [#allocation4], 0  ;;  %s358_s21 = smov [#allocation3]   ;;  %s359_s23 = smov 64   ;;  %s433_s0 = inlined_call_operand.vmem [shape: bf16[16,128], index: 0, kind: input, shape index: {}]   ;;  %s434_s1 = inlined_call_operand.vmem [shape: bf16[128,128], index: 1, kind: input, shape index: {}]   ;;  %s435_s2 = inlined_call_operand.vmem [shape: f32[1,128], index: 2, kind: input, shape index: {}]   ;;  %s436_s3 = inlined_call_operand.vmem [shape: bf16[16,128], index: 3, kind: input, shape index: {}]   ;;  %s437_s4 = inlined_call_operand.hbm [shape: bf16[128,128], index: 4, kind: input, shape index: {}]   ;;  %s438_s5 = inlined_call_operand.vmem [shape: f32[16,128], index: 5, kind: output, shape index: {}]  }
   0x1   :  { %s23_s20 = sshll.u32 %s437_s4, 4  ;;  %s25_s22 = sshll.u32 %s358_s21, 4  ;;  %s24_s20 = int_to_ptr.hbm [resolvable:$true] %s23_s20  ;;  %s26_s22 = int_to_ptr.vmem [resolvable:$true] %s25_s22 }
   0x2   :  { %s360_s24 = smov 4  }
   0x3   :  { %31 = dma.hbm_to_vmem [thread:$0]  %s24_s20, 1024, %s26_s22, [#allocation4], %s359_s23, %s359_s23, %s360_s24  }
   0x4   :  { %356 = dma.done.wait [#allocation4], 1024  }
   0x5   :  { %357 = vsyncadd [#allocation4], 4294966272  ;;  %v318_v0 = vld [vmem:[%s434_s1 + $0x38] sm:$0xff]  ;;  %v317_v2 = vld [vmem:[%s434_s1 + $0x30] sm:$0xff] }
   0x6   :  { %v327_v1 = vld [vmem:[#allocation3 + $0x38] sm:$0xff]  ;;  %120 = vmatpush.bf16.msra.mxu0 %v318_v0  ;;  %v326_v3 = vld [vmem:[#allocation3 + $0x30] sm:$0xff]  ;;  %v316_v4 = vld [vmem:[%s434_s1 + $0x28] sm:$0xff] }
   0x7   :  { %213 = vmatpush.bf16.msra.mxu1 %v327_v1  ;;  %v325_v5 = vld [vmem:[#allocation3 + $0x28] sm:$0xff]  ;;  %v315_v6 = vld [vmem:[%s434_s1 + $0x20] sm:$0xff]  ;;  %v314_v8 = vld [vmem:[%s434_s1 + $0x18] sm:$0xff] }
   0x8   :  { %v324_v7 = vld [vmem:[#allocation3 + $0x20] sm:$0xff]  ;;  %v323_v9 = vld [vmem:[#allocation3 + $0x18] sm:$0xff]  ;;  %v313_v10 = vld [vmem:[%s434_s1 + $0x10] sm:$0xff] }
   0x9   :  { %v322_v11 = vld [vmem:[#allocation3 + $0x10] sm:$0xff]  ;;  %v312_v12 = vld [vmem:[%s434_s1 + $0x8] sm:$0xff]  ;;  %v311_v14 = vld [vmem:[%s434_s1] sm:$0xff] }
   0xa   :  { %121 = vmatpush.bf16.msra.mxu0 %v317_v2  ;;  %v321_v13 = vld [vmem:[#allocation3 + $0x8] sm:$0xff]  ;;  %v320_v15 = vld [vmem:[#allocation3] sm:$0xff] }
   0xb   :  { %214 = vmatpush.bf16.msra.mxu1 %v326_v3  ;;  %v310_v16 = vld [vmem:[%s433_s0] sm:$0xff] }
   0xc   :  { %v319_v17 = vld [vmem:[%s436_s3] sm:$0xff] }
   0xd   :  { %v331_v18 = vld [vmem:[%s435_s2] ss:$0 sm:$0xff] }
   0xe   :  { %122 = vmatpush.bf16.msra.mxu0 %v316_v4 }
   0xf   :  { %215 = vmatpush.bf16.msra.mxu1 %v325_v5 }
  0x12   :  { %123 = vmatpush.bf16.msra.mxu0 %v315_v6 }
  0x13   :  { %216 = vmatpush.bf16.msra.mxu1 %v324_v7 }
  0x16   :  { %124 = vmatpush.bf16.msra.mxu0 %v314_v8 }
  0x17   :  { %217 = vmatpush.bf16.msra.mxu1 %v323_v9 }
  0x1a   :  { %125 = vmatpush.bf16.msra.mxu0 %v313_v10 }
  0x1b   :  { %218 = vmatpush.bf16.msra.mxu1 %v322_v11 }
  0x1e   :  { %126 = vmatpush.bf16.msra.mxu0 %v312_v12 }
  0x1f   :  { %219 = vmatpush.bf16.msra.mxu1 %v321_v13 }
  0x22   :  { %127 = vmatpush.bf16.msra.mxu0 %v311_v14 }
  0x23   :  { %220 = vmatpush.bf16.msra.mxu1 %v320_v15 }
  0x25   :  { %128 = vmatmul.bf16.vlgmr.msra.gmra.mxu0 %v310_v16 }
  0x26   :  { %221 = vmatmul.bf16.vlgmr.msra.gmra.mxu1 %v319_v17 }
  0xa2   :  { %v129_v19 = vpop.f32.mrf.mxu0 }
  0xa3   :  { %v222_v20 = vpop.f32.mrf.mxu1  ;;  %v134_v21 = vadd.f32 %v331_v18, %v129_v19 }
  0xa5   :  { %v229_v22 = vadd.f32 %v222_v20, %v134_v21 }
  0xa7   :  { %231 = vst [vmem:[%s438_s5] sm:$0xff] %v229_v22 }
  0xaa   :  { %v131_v23 = vpop.f32.mrf.mxu0 }
  0xab   :  { %v135_v24 = vadd.f32 %v331_v18, %v131_v23  ;;  %v224_v25 = vpop.f32.mrf.mxu1 }
  0xad   :  { %v230_v26 = vadd.f32 %v224_v25, %v135_v24 }
  0xaf   :  { %232 = vst [vmem:[%s438_s5 + $0x8] sm:$0xff] %v230_v26 }
  0xb0   :  { %237 = vsyncpa [#allocation4], 1 }

</bundles_post_ra>
